<compile_context>
chip_gen: v7x
topology: tpu7x:2x2x1
jax: 0.10.0
libtpu: 0.0.40
codegen_flags: <defaults>
</compile_context>

<pallas_src>
import jax
import jax.numpy as jnp
from jax.experimental import pallas as pl
from jax.experimental.pallas import tpu as pltpu


def _round_up(x, m):
    return (x + m - 1) // m * m


def _sigmoid(z):
    # Plain exp + divide (exp rides the EUP slot).
    # TODO(synk): if the epilogue ever becomes binding, switch the divide to
    # pl.reciprocal(..., approx=True) so it also lands on the EUP.
    return 1.0 / (1.0 + jnp.exp(-z))


# ------------------------------ Pallas kernel -------------------------------


def _make_attcov_kernel(batch_block, to_pad):
    def kernel(x_ref, w_ref, bias_ref, o_ref):
        # x_ref : (Bb, C*T, tn)     bf16  input slab, lanes = nodes
        # w_ref : (2*To_pad, C*T)   bf16  [weight.T @ Toeplitz(conv1) ; Toeplitz(conv2)]
        # bias  : (2*To_pad, 1)     f32   [conv1_b * weight.sum(0) ; conv2_b]
        # o_ref : (Bb, To_pad, tn)  f32
        w = w_ref[...]
        bias = bias_ref[...]
        for i in range(batch_block):          # static unroll over the batch block
            y = jnp.dot(w, x_ref[i], preferred_element_type=jnp.float32) + bias
            g = y[:to_pad]                     # sublane-aligned (To_pad % 8 == 0)
            h = y[to_pad:]
            o_ref[i] = _sigmoid(g * h)
    return kernel


# ---------------------- weight-only transforms (host) -----------------------


def _conv1_toeplitz(w1, C, K):
    """A1 (Ca, C*T): (A1 @ x[b].reshape(C*T,N))[i,n] == conv1(x.permute(0,2,1,3))[b,0,i,n] - b1."""
    T = w1.shape[0]
    Ca = C - K + 1
    k = jnp.arange(C)[None, :] - jnp.arange(Ca)[:, None]            # (Ca, C)
    valid = (k >= 0) & (k < K)
    vals = jnp.take(w1.T, jnp.clip(k, 0, K - 1), axis=0)            # (Ca, C, T) = w1[t, c-i]
    A = jnp.where(valid[:, :, None], vals, 0.0)
    return A.reshape(Ca, C * T)


def _conv2_toeplitz(w2, T, K):
    """A2 (To, C*T): (A2 @ x[b].reshape(C*T,N))[j,n] == conv2(x)[b,0,j,n] - b2."""
    C = w2.shape[0]
    To = T - K + 1
    k = jnp.arange(T)[None, :] - jnp.arange(To)[:, None]            # (To, T)
    valid = (k >= 0) & (k < K)
    vals = jnp.take(w2, jnp.clip(k, 0, K - 1), axis=1)              # (C, To, T) = w2[c, t-j]
    A = jnp.where(valid[:, None, :], jnp.transpose(vals, (1, 0, 2)), 0.0)
    return A.reshape(To, C * T)


def _prep_fused_weights(params, C, T, K):
    """Single fused (2*To_pad, C*T) weight and (2*To_pad, 1) bias, in f32."""
    w1, b1 = params["conv1_w"], params["conv1_b"]     # (T, K), ()
    w2, b2 = params["conv2_w"], params["conv2_b"]     # (C, K), ()
    weight = params["weight"]                         # (C-K+1, T-K+1); module needs K == 3
    Ca, To = C - K + 1, T - K + 1
    assert weight.shape == (Ca, To), (weight.shape, (Ca, To))
    To_pad = _round_up(To, 8)
    CT = C * T

    A1 = _conv1_toeplitz(w1, C, K)                                  # (Ca, CT)
    A2 = _conv2_toeplitz(w2, T, K)                                  # (To, CT)
    # Fold attention matmul + conv1 bias into conv1's Toeplitz:
    #   weight.T @ (A1 @ x + b1) = (weight.T @ A1) @ x + b1 * weight.sum(0)[:, None]
    M1 = jnp.dot(weight.T.astype(jnp.float32), A1.astype(jnp.float32))   # (To, CT)

    W = jnp.zeros((2 * To_pad, CT), jnp.float32)
    W = W.at[:To].set(M1).at[To_pad:To_pad + To].set(A2)
    bias = jnp.zeros((2 * To_pad, 1), jnp.float32)
    bias = bias.at[:To, 0].set(b1 * jnp.sum(weight, axis=0))
    bias = bias.at[To_pad:To_pad + To, 0].set(b2)
    return W, bias


# ------------------------------ tiling helpers -------------------------------


def _pick_tile_n(n_pad, ct, to_pad, batch_block, budget_bytes):
    """Largest lane tile (multiple of 128, <= 1024) fitting the VMEM budget."""
    for tn in (1024, 512, 256, 128):
        if n_pad % tn:
            continue
        x_bytes = 2 * batch_block * ct * tn * 2          # double-buffered bf16 x slab
        o_bytes = 2 * batch_block * to_pad * tn * 4      # double-buffered f32 output
        w_bytes = 2 * to_pad * ct * 2 + 2 * to_pad * 4   # fused weight + bias (1 buffer)
        if x_bytes + o_bytes + w_bytes <= budget_bytes:
            return tn
    return 128


def _pick_batch_block(B, n_node_tiles):
    """Batches folded per grid step; keep >=2 total steps (v7x has 2 TensorCores)."""
    if B <= 1 or n_node_tiles >= 2:
        return 1
    bb = max(1, B // 2)
    while B % bb:
        bb -= 1
    return bb


# --------------------------------- wrapper ----------------------------------


def attcov_forward(x, params, K, *, vmem_limit_bytes=32 * 1024 * 1024):
    """Fused ATTCov forward: (B, C, T, N) -> (B, 1, T-K+1, N), f32."""
    B, C, T, N = x.shape
    To = T - K + 1
    To_pad = _round_up(To, 8)
    CT = C * T

    # Weight-only prep (tiny GEMM + scatters); runs as plain XLA ops outside the kernel.
    W, bias = _prep_fused_weights(params, C, T, K)
    W_bf = W.astype(jnp.bfloat16)                        # bf16 MXU input, f32 accumulate

    # Lane-dense node axis: pad N to a multiple of 128 -> unmasked full-lane stores.
    Np = _round_up(N, 128)
    x_flat = x.reshape(B, CT, N).astype(jnp.bfloat16)    # free view + bf16 (halves HBM reads)
    if Np != N:
        x_flat = jnp.pad(x_flat, ((0, 0), (0, 0), (0, Np - N)))

    # Grid / tiling (both axes "parallel" -> v7x megacore shards them).
    budget = (vmem_limit_bytes * 3) // 4
    tn = _pick_tile_n(Np, CT, To_pad, 1, budget)
    bb = _pick_batch_block(B, Np // tn)
    if bb > 1:
        tn = _pick_tile_n(Np, CT, To_pad, bb, budget)
    grid = (B // bb, Np // tn)

    cost = pl.CostEstimate(
        flops=2 * B * (2 * To_pad) * CT * Np,
        transcendentals=B * To_pad * Np,
        bytes_accessed=(x_flat.size * 2 + W_bf.size * 2 + bias.size * 4
                        + B * To_pad * Np * 4),
    )
    kernel = _make_attcov_kernel(bb, To_pad)

    def call(single_buffer_weights):
        # Grid-invariant inputs (fused weight + bias) don't need a second pipeline
        # buffer; single-buffering halves their resident VMEM (matters on v7x).
        wmode = {"pipeline_mode": pl.Buffered(1)} if single_buffer_weights else {}
        out = pl.pallas_call(
            kernel,
            out_shape=jax.ShapeDtypeStruct((B, To_pad, Np), jnp.float32),
            grid_spec=pltpu.PrefetchScalarGridSpec(
                num_scalar_prefetch=0,
                grid=grid,
                in_specs=[
                    pl.BlockSpec((bb, CT, tn), lambda b, j: (b, 0, j)),          # x slab
                    pl.BlockSpec((2 * To_pad, CT), lambda b, j: (0, 0), **wmode),  # fused W
                    pl.BlockSpec((2 * To_pad, 1), lambda b, j: (0, 0), **wmode),   # fused bias
                ],
                out_specs=pl.BlockSpec((bb, To_pad, tn), lambda b, j: (b, 0, j)),
            ),
            compiler_params=pltpu.CompilerParams(
                dimension_semantics=("parallel", "parallel"),
                vmem_limit_bytes=vmem_limit_bytes),
            cost_estimate=cost,
        )(x_flat, W_bf, bias)
        return jax.block_until_ready(out)

    try:
        out = call(True)
    except Exception:   # pl.Buffered(1) unsupported on this jax build -> default buffering
        out = call(False)

    return out[:, None, :To, :N]                         # (B, 1, T-K+1, N)


# ---------------------------- pure-JAX references ----------------------------


def attcov_reference(x, params, K):
    """Full-f32 replica of the PyTorch module semantics."""
    w1, b1 = params["conv1_w"], params["conv1_b"]
    w2, b2 = params["conv2_w"], params["conv2_b"]
    weight = params["weight"]
    B, C, T, N = x.shape
    Ca, To = C - K + 1, T - K + 1
    hi = jax.lax.Precision.HIGHEST
    conv_a = b1 + sum(jnp.einsum("bctn,t->bcn", x[:, k:k + Ca, :, :], w1[:, k], precision=hi)
                      for k in range(K))                    # (B, Ca, N)
    conv_b = b2 + sum(jnp.einsum("bctn,c->btn", x[:, :, k:k + To, :], w2[:, k], precision=hi)
                      for k in range(K))                    # (B, To, N)
    g = jnp.einsum("bin,io->bon", conv_a, weight, precision=hi)   # (B, To, N)
    return jax.nn.sigmoid(g * conv_b)[:, None, :, :]


def attcov_reference_bf16(x, params, K):
    """Plain-jnp replica of the kernel's exact math (bf16 inputs, f32 accumulate)."""
    B, C, T, N = x.shape
    To = T - K + 1
    To_pad = _round_up(To, 8)
    W, bias = _prep_fused_weights(params, C, T, K)
    Wf = W.astype(jnp.bfloat16).astype(jnp.float32)
    xf = x.reshape(B, C * T, N).astype(jnp.bfloat16).astype(jnp.float32)
    y = jnp.einsum("oc,bcn->bon", Wf, xf) + bias[None]
    z = y[:, :To_pad] * y[:, To_pad:]
    return _sigmoid(z)[:, None, :To, :]


# ----------------------------------- main ------------------------------------

if __name__ == "__main__":
    key = jax.random.PRNGKey(0)
    B, C, T, N = 2, 4, 16, 16   # (batch, c_in, T_slot, n_node)
    K = 3

    kx, k1, k2, k3, k4, k5 = jax.random.split(key, 6)
    x = jax.random.normal(kx, (B, C, T, N), jnp.float32)
    params = {
        # nn.Conv2d(T_slot, 1, (K, 1)): weight (1, T, K, 1) stored as (T, K)
        "conv1_w": 0.3 * jax.random.normal(k1, (T, K), jnp.float32),
        "conv1_b": 0.1 * jax.random.normal(k2, (), jnp.float32),
        # nn.Conv2d(c_in, 1, (K, 1)): weight (1, C, K, 1) stored as (C, K)
        "conv2_w": 0.3 * jax.random.normal(k3, (C, K), jnp.float32),
        "conv2_b": 0.1 * jax.random.normal(k4, (), jnp.float32),
        # nn.Parameter(torch.rand(c_in - 2, T_slot - 2))
        "weight": jax.random.uniform(k5, (C - 2, T - 2), dtype=jnp.float32),
    }

    out = attcov_forward(x, params, K)
    jax.block_until_ready(out)

    assert out.shape == (B, 1, T - K + 1, N), out.shape
    assert bool(jnp.all(jnp.isfinite(out)))

    # Tight check vs a plain-jnp replica of the exact kernel math (bf16 in, f32 acc).
    ref_bf = attcov_reference_bf16(x, params, K)
    assert bool(jnp.allclose(out, ref_bf, atol=1e-3, rtol=1e-3)), \
        float(jnp.max(jnp.abs(out - ref_bf)))

    # Loose check vs the full-f32 module semantics (bf16 quantization tolerance).
    ref_f32 = attcov_reference(x, params, K)
    assert bool(jnp.allclose(out, ref_f32, atol=6e-2, rtol=0.0)), \
        float(jnp.max(jnp.abs(out - ref_f32)))

    print("KERNEL_OK")
</pallas_src>

<mosaic_0001>
module attributes {stable_mosaic.version = 11 : i64} {
  func.func @kernel(%arg0: i32, %arg1: i32, %arg2: memref<1x64x128xbf16, #tpu.memory_space<vmem>>, %arg3: memref<32x64xbf16, #tpu.memory_space<vmem>>, %arg4: memref<32x1xf32, #tpu.memory_space<vmem>>, %arg5: memref<1x16x128xf32, #tpu.memory_space<vmem>>) attributes {dimension_semantics = [#tpu.dimension_semantics<parallel>, #tpu.dimension_semantics<parallel>], iteration_bounds = array<i64: 2, 1>, scalar_prefetch = 0 : i64, scratch_operands = 0 : i64, tpu.core_type = #tpu.core_type<tc>, window_params = [{transform_indices = @transform_0, window_bounds = array<i64: 1, 64, 128>}, {pipeline_mode = #tpu.pipeline_mode<synchronous>, transform_indices = @transform_1, window_bounds = array<i64: 32, 64>}, {pipeline_mode = #tpu.pipeline_mode<synchronous>, transform_indices = @transform_2, window_bounds = array<i64: 32, 1>}, {transform_indices = @transform_3, window_bounds = array<i64: 1, 16, 128>}]} {
    %c0 = arith.constant 0 : index
    %c0_0 = arith.constant 0 : index
    %0 = vector.load %arg3[%c0, %c0_0] : memref<32x64xbf16, #tpu.memory_space<vmem>>, vector<32x64xbf16>
    %c0_1 = arith.constant 0 : index
    %c0_2 = arith.constant 0 : index
    %1 = vector.load %arg4[%c0_1, %c0_2] : memref<32x1xf32, #tpu.memory_space<vmem>>, vector<32x1xf32>
    %c0_3 = arith.constant 0 : index
    %c0_4 = arith.constant 0 : index
    %c0_5 = arith.constant 0 : index
    %2 = vector.load %arg2[%c0_3, %c0_4, %c0_5] : memref<1x64x128xbf16, #tpu.memory_space<vmem>>, vector<1x64x128xbf16>
    %3 = vector.shape_cast %2 : vector<1x64x128xbf16> to vector<64x128xbf16>
    %cst = arith.constant dense<0.000000e+00> : vector<32x128xf32>
    %4 = tpu.matmul %0, %3, %cst {dimension_numbers = #tpu.dot_dimension_numbers<[1], [0], [0], [1], [0, 0, 1, 1], [], []>} : vector<32x64xbf16>, vector<64x128xbf16>, vector<32x128xf32> -> vector<32x128xf32>
    %5 = vector.broadcast %1 : vector<32x1xf32> to vector<32x128xf32>
    %6 = arith.addf %4, %5 : vector<32x128xf32>
    %7 = vector.extract_strided_slice %6 {offsets = [0, 0], sizes = [16, 128], strides = [1, 1]} : vector<32x128xf32> to vector<16x128xf32>
    %8 = vector.extract_strided_slice %6 {offsets = [16, 0], sizes = [16, 128], strides = [1, 1]} : vector<32x128xf32> to vector<16x128xf32>
    %9 = arith.mulf %7, %8 : vector<16x128xf32>
    %cst_6 = arith.constant 0.000000e+00 : f32
    %10 = vector.broadcast %cst_6 : f32 to vector<16x128xf32>
    %11 = arith.subf %10, %9 : vector<16x128xf32>
    %12 = math.exp %11 : vector<16x128xf32>
    %cst_7 = arith.constant 1.000000e+00 : f32
    %13 = vector.broadcast %cst_7 : f32 to vector<16x128xf32>
    %14 = arith.addf %13, %12 : vector<16x128xf32>
    %cst_8 = arith.constant 1.000000e+00 : f32
    %15 = vector.broadcast %cst_8 : f32 to vector<16x128xf32>
    %16 = arith.divf %15, %14 : vector<16x128xf32>
    %c0_9 = arith.constant 0 : index
    %c0_10 = arith.constant 0 : index
    %c0_11 = arith.constant 0 : index
    %17 = vector.load %arg5[%c0_9, %c0_10, %c0_11] : memref<1x16x128xf32, #tpu.memory_space<vmem>>, vector<1x16x128xf32>
    %18 = vector.shape_cast %17 : vector<1x16x128xf32> to vector<16x128xf32>
    %19 = vector.shape_cast %16 : vector<16x128xf32> to vector<1x16x128xf32>
    tpu.vector_store %arg5[%c0_9, %c0_10, %c0_11], %19 {strides = array<i32>} : memref<1x16x128xf32, #tpu.memory_space<vmem>>, vector<1x16x128xf32>,
    return
  }
  func.func @transform_0(%arg0: i32, %arg1: i32) -> (i32, i32, i32) {
    %c0_i32 = arith.constant 0 : i32
    %c0_i32_0 = arith.constant 0 : i32
    return %arg0, %c0_i32, %arg1 : i32, i32, i32
  }
  func.func @transform_1(%arg0: i32, %arg1: i32) -> (i32, i32) {
    %c0_i32 = arith.constant 0 : i32
    %c0_i32_0 = arith.constant 0 : i32
    %c0_i32_1 = arith.constant 0 : i32
    return %c0_i32, %c0_i32_0 : i32, i32
  }
  func.func @transform_2(%arg0: i32, %arg1: i32) -> (i32, i32) {
    %c0_i32 = arith.constant 0 : i32
    %c0_i32_0 = arith.constant 0 : i32
    %c0_i32_1 = arith.constant 0 : i32
    return %c0_i32, %c0_i32_0 : i32, i32
  }
  func.func @transform_3(%arg0: i32, %arg1: i32) -> (i32, i32, i32) {
    %c0_i32 = arith.constant 0 : i32
    %c0_i32_0 = arith.constant 0 : i32
    return %arg0, %c0_i32, %arg1 : i32, i32, i32
  }
}

module attributes {stable_mosaic.version = 11 : i64} {
  func.func @kernel(%arg0: i32, %arg1: i32, %arg2: memref<1x64x128xbf16, #tpu.memory_space<vmem>>, %arg3: memref<32x64xbf16, #tpu.memory_space<vmem>>, %arg4: memref<32x1xf32, #tpu.memory_space<vmem>>, %arg5: memref<1x16x128xf32, #tpu.memory_space<vmem>>) attributes {dimension_semantics = [#tpu.dimension_semantics<parallel>, #tpu.dimension_semantics<parallel>], iteration_bounds = array<i64: 2, 1>, scalar_prefetch = 0 : i64, scratch_operands = 0 : i64, tpu.core_type = #tpu.core_type<tc>, window_params = [{transform_indices = @transform_0, window_bounds = array<i64: 1, 64, 128>}, {pipeline_mode = #tpu.pipeline_mode<synchronous>, transform_indices = @transform_1, window_bounds = array<i64: 32, 64>}, {pipeline_mode = #tpu.pipeline_mode<synchronous>, transform_indices = @transform_2, window_bounds = array<i64: 32, 1>}, {transform_indices = @transform_3, window_bounds = array<i64: 1, 16, 128>}]} {
    %c0 = arith.constant 0 : index
    %c0_0 = arith.constant 0 : index
    %0 = vector.load %arg3[%c0, %c0_0] : memref<32x64xbf16, #tpu.memory_space<vmem>>, vector<32x64xbf16>
    %c0_1 = arith.constant 0 : index
    %c0_2 = arith.constant 0 : index
    %1 = vector.load %arg4[%c0_1, %c0_2] : memref<32x1xf32, #tpu.memory_space<vmem>>, vector<32x1xf32>
    %c0_3 = arith.constant 0 : index
    %c0_4 = arith.constant 0 : index
    %c0_5 = arith.constant 0 : index
    %2 = vector.load %arg2[%c0_3, %c0_4, %c0_5] : memref<1x64x128xbf16, #tpu.memory_space<vmem>>, vector<1x64x128xbf16>
    %3 = vector.shape_cast %2 : vector<1x64x128xbf16> to vector<64x128xbf16>
    %cst = arith.constant dense<0.000000e+00> : vector<32x128xf32>
    %4 = tpu.matmul %0, %3, %cst {dimension_numbers = #tpu.dot_dimension_numbers<[1], [0], [0], [1], [0, 0, 1, 1], [], []>} : vector<32x64xbf16>, vector<64x128xbf16>, vector<32x128xf32> -> vector<32x128xf32>
    %5 = vector.broadcast %1 : vector<32x1xf32> to vector<32x128xf32>
    %6 = arith.addf %4, %5 : vector<32x128xf32>
    %7 = vector.extract_strided_slice %6 {offsets = [0, 0], sizes = [16, 128], strides = [1, 1]} : vector<32x128xf32> to vector<16x128xf32>
    %8 = vector.extract_strided_slice %6 {offsets = [16, 0], sizes = [16, 128], strides = [1, 1]} : vector<32x128xf32> to vector<16x128xf32>
    %9 = arith.mulf %7, %8 : vector<16x128xf32>
    %cst_6 = arith.constant 0.000000e+00 : f32
    %10 = vector.broadcast %cst_6 : f32 to vector<16x128xf32>
    %11 = arith.subf %10, %9 : vector<16x128xf32>
    %12 = math.exp %11 : vector<16x128xf32>
    %cst_7 = arith.constant 1.000000e+00 : f32
    %13 = vector.broadcast %cst_7 : f32 to vector<16x128xf32>
    %14 = arith.addf %13, %12 : vector<16x128xf32>
    %cst_8 = arith.constant 1.000000e+00 : f32
    %15 = vector.broadcast %cst_8 : f32 to vector<16x128xf32>
    %16 = arith.divf %15, %14 : vector<16x128xf32>
    %c0_9 = arith.constant 0 : index
    %c0_10 = arith.constant 0 : index
    %c0_11 = arith.constant 0 : index
    %17 = vector.load %arg5[%c0_9, %c0_10, %c0_11] : memref<1x16x128xf32, #tpu.memory_space<vmem>>, vector<1x16x128xf32>
    %18 = vector.shape_cast %17 : vector<1x16x128xf32> to vector<16x128xf32>
    %19 = vector.shape_cast %16 : vector<16x128xf32> to vector<1x16x128xf32>
    tpu.vector_store %arg5[%c0_9, %c0_10, %c0_11], %19 {strides = array<i32>} : memref<1x16x128xf32, #tpu.memory_space<vmem>>, vector<1x16x128xf32>,
    return
  }
  func.func @transform_0(%arg0: i32, %arg1: i32) -> (i32, i32, i32) {
    %c0_i32 = arith.constant 0 : i32
    %c0_i32_0 = arith.constant 0 : i32
    return %arg0, %c0_i32, %arg1 : i32, i32, i32
  }
  func.func @transform_1(%arg0: i32, %arg1: i32) -> (i32, i32) {
    %c0_i32 = arith.constant 0 : i32
    %c0_i32_0 = arith.constant 0 : i32
    %c0_i32_1 = arith.constant 0 : i32
    return %c0_i32, %c0_i32_0 : i32, i32
  }
  func.func @transform_2(%arg0: i32, %arg1: i32) -> (i32, i32) {
    %c0_i32 = arith.constant 0 : i32
    %c0_i32_0 = arith.constant 0 : i32
    %c0_i32_1 = arith.constant 0 : i32
    return %c0_i32, %c0_i32_0 : i32, i32
  }
  func.func @transform_3(%arg0: i32, %arg1: i32) -> (i32, i32, i32) {
    %c0_i32 = arith.constant 0 : i32
    %c0_i32_0 = arith.constant 0 : i32
    return %arg0, %c0_i32, %arg1 : i32, i32, i32
  }
}

</mosaic_0001>

<bundles_post_ra>
// kernel: tpu_custom_call.1
= control target key start
LH: loop header
LB: loop body
LE: loop exit
PB: predicated region body
PF: predicated region fallthrough
CT: control target
= control target key end

     0   :  { %8 = vsyncpa [#allocation3], 0  ;;  %s912_s0 = inlined_call_operand.hbm [shape: bf16[2,64,128], index: 0, kind: input, shape index: {}]   ;;  %s913_s1 = inlined_call_operand.vmem [shape: bf16[32,64], index: 1, kind: input, shape index: {}]   ;;  %s914_s2 = inlined_call_operand.vmem [shape: f32[32,1], index: 2, kind: input, shape index: {}]   ;;  %s915_s3 = inlined_call_operand.hbm [shape: f32[2,16,128], index: 3, kind: output, shape index: {}]  }
   0x1   :  { %10 = vsyncpa [#allocation3 + $0x1], 0 }
   0x2   :  { %11 = vsyncpa [#allocation4], 0 }
   0x3   :  { %13 = vsyncpa [#allocation4 + $0x1], 0  ;;  %s716_s12 = smov 0   ;;  %s718_s13 = smov 0  }
   0x4   :  { %s720_s14 = smov 0   ;;  %s722_s15 = smov 0  }
   0x5   :  { %s724_s16 = smov 0   ;;  %s726_s17 = smov 0  }
   0x6 LB: > { %s449_s18 = sadd.s32 4294967295, %s687_s17   ;;  %s450_s19 = sadd.s32 4294967294, %s687_s17   ;;  %s687_s17 = sphi %s726_s17, %s19_s17   ;;  %s683_s16 = sphi %s724_s16, %s930_s16   ;;  %s679_s15 = sphi %s722_s15, %s929_s15   ;;  %s675_s14 = sphi %s720_s14, %s928_s14   ;;  %s671_s13 = sphi %s718_s13, %s927_s13   ;;  %s667_s12 = sphi %s716_s12, %s926_s12  }
   0x7   : > { %s31_s20 = sadd.s32 1, %s683_s16  ;;  %s40_s21 = sadd.s32 1, %s675_s14 }
   0x8   : > { %p33_p0 = scmp.ge.s32.totalorder %s31_s20, 2  ;;  %p47_p1 = scmp.ne.s32.totalorder %s675_s14, %s671_s13 }
   0x9   : > { %p48_p2 = scmp.eq.s32.totalorder %s687_s17, 0  ;;  %p53_p3 = scmp.ne.s32.totalorder %s671_s13, %s667_s12 }
   0xa   : > { %s932_s20 = smov (%p33_p0, %s31_s20), 0  ;;  %p54_p5 = scmp.eq.s32.totalorder %s449_s18, 0 }
   0xb   : > { %p757_p4 = por %p48_p2, %p47_p1  ;;  %s35_s23 = ssub.s32 %s683_s16, %s932_s20 }
   0xc   : > { %p121_p6 = scmp.eq.s32.totalorder %s449_s18, 1  ;;  %p38_p7 = scmp.eq.s32.totalorder %s35_s23, 0 }
   0xd   : > { %p763_p8 = por %p54_p5, %p53_p3  ;;  %p127_p10 = scmp.eq.s32.totalorder %s450_s19, 1 }
   0xe   : > { %p767_p9 = por %p121_p6, %p47_p1  ;;  %p504_p13 = scmp.lt.s32.totalorder %s687_s17, 2 }
   0xf   : > { %s772_s26 = scalar_select %p38_p7, %s675_s14, %s40_s21  }
  0x10   : > { %s919_s25 = scalar_select %p767_p9, 1, 0 }
  0x11   : > { %p774_p11 = por %p127_p10, %p53_p3  ;;  %s153_s28 = sand.u32 1, %s675_s14  }
  0x12   : > { %s453_s29 = sshll.u32 %s153_s28, 5  ;;  %s472_s30 = sshll.u32 %s683_s16, 9 }
  0x13   : > { %s920_s27 = scalar_select %p774_p11, 1, 0 }
  0x14   : > { %s785_s6 = scalar_lea.hbm %s912_s0, %s472_s30  ;;  %s157_s7 = scalar_lea.vmem [#allocation2], %s453_s29 }
  0x15   : > { %s165_s8 = sshll.u32 %s157_s7, 4  ;;  %p791_p0 = pnand %p504_p13, %p757_p4  ;;  %s787_s8 = int_to_ptr.vmem [resolvable:$true] %s165_s8 }
  0x16   : > { %s796_s10 = scalar_lea.sflag [#allocation3], %s153_s28  ;;  %s575_s11 = scalar_lea.hbm %s785_s6, 512 }
  0x17   : > { %p576_p2 = scmp.ne.s32.totalorder %s785_s6, %s575_s11  ;;  %p577_p3 = pneg %p791_p0 }
  0x18   : > { %s580_s21 = scalar_lea.hbm %s912_s0, 1024  ;;  %p581_p4 = scmp.lt.u32.totalorder %s785_s6, %s912_s0 }
  0x19   : > { %p578_p5 = pnand %p577_p3, %p576_p2  ;;  %p582_p7 = scmp.lt.u32.totalorder %s580_s21, %s575_s11 }
  0x1a   : > { %p584_p13 = scmp.lt.u32.totalorder %s575_s11, %s785_s6 }
  0x1b   : > { %p579_p6 = pneg %p578_p5  ;;  %p583_p10 = por %p582_p7, %p581_p4 }
  0x1d   : > { %p585_p12 = por %p584_p13, %p583_p10 }
  0x1f   : > { %p586_p1 = pnand %p585_p12, %p579_p6 }
  0x21   : > { %589 = shalt.err (!%p586_p1)
}
  0x22   : > { %s590_s28 = scalar_lea.vmem %s787_s8, 512  ;;  %s689_s29 = smov [#allocation2]  }
  0x23   : > { %p591_p2 = scmp.ne.s32.totalorder %s787_s8, %s590_s28  ;;  %s595_s30 = sshll.u32 %s689_s29, 4  ;;  %s596_s30 = int_to_ptr.vmem [resolvable:$false] %s595_s30 }
  0x24   : > { %s597_s4 = scalar_lea.vmem %s596_s30, 1024  ;;  %p598_p9 = scmp.lt.s32.totalorder %s787_s8, %s596_s30 }
  0x25   : > { %p593_p5 = pnand %p591_p2, %p577_p3  ;;  %p599_p4 = scmp.lt.s32.totalorder %s597_s4, %s590_s28 }
  0x27   : > { %p594_p11 = pneg %p593_p5  ;;  %p600_p7 = por %p599_p4, %p598_p9 }
  0x29   : > { %p601_p10 = pnand %p600_p7, %p594_p11 }
  0x2b   : > { %604 = shalt.err (!%p601_p10)
}
  0x2c   : > { %s690_s5 = smov 64   ;;  %s691_s7 = smov 4  }
  0x2d   : > { %499 = dma.hbm_to_vmem [thread:$0]  (!%p791_p0), %s785_s6, 512, %s787_s8, %s796_s10, %s690_s5, %s690_s5, %s691_s7  }
  0x2e   : > { %p173_p12 = scmp.lt.s32.totalorder %s687_s17, 3  ;;  %p922_p1 = scmp.ge.s32.totalorder %s687_s17, 1 }
  0x30   : > { %p174_p3 = pnand %p922_p1, %p173_p12 }
  0x31   : > { %s828_s11 = sand.u32 (!%p174_p3), 1, %s671_s13  }
  0x32   : > { %177 = sbr.rel (%p174_p3) target bundleno = 338 (0x152), region = 32  ;;  %s457_s18 = sshll.u32 (!%p174_p3), %s828_s11, 5 }
  0x33   : > { %s180_s19 = scalar_lea.sflag (!%p174_p3), [#allocation3], %s828_s11  ;;  %s183_s21 = scalar_lea.vmem (!%p174_p3), [#allocation2], %s457_s18 }
  0x39   : > { %658 = dma.done.wait (%p763_p8), %s180_s19, 512  }
  0x3a   : > { %660 = vsyncadd (%p763_p8), %s180_s19, 4294966784  ;;  %v692_v0 = vmov 0   ;;  %v561_v1 = vld [vmem:[%s183_s21] sm:$0xff]   ;;  %v562_v2 = vld [vmem:[%s183_s21 + $0x8] sm:$0xff]   ;;  %vm277_vm0 = vcmask 523264   ;;  %s458_s7 = sshll.u32 %s828_s11, 4 }
  0x3b   : > { %560 = vset.pattern.permute.xlu1 %v692_v0  ;;  %559 = vset.pattern.permute.xlu0 %v692_v0  ;;  %v563_v3 = vld [vmem:[%s183_s21 + $0x10] sm:$0xff]   ;;  %v565_v4 = vld [vmem:[%s913_s1] sm:$0xff]   ;;  %v564_v7 = vld [vmem:[%s183_s21 + $0x18] sm:$0xff]   ;;  %s473_s18 = sshll.u32 %s679_s15, 8  ;;  %s205_s19 = scalar_lea.vmem [#allocation5], %s458_s7 }
  0x3c   : > { %480 = vmatprep.subr.bf16.mxu0 %v561_v1  ;;  %488 = vmatprep.mubr.msk.bf16.mxu0 %vm277_vm0, %v565_v4  ;;  %v213_v5 = vld [vmem:[%s914_s2 + $0x10] sm:$0xff]  ;;  %v211_v6 = vld [vmem:[%s914_s2] sm:$0xff]  ;;  %v214_v8 = vld [vmem:[%s914_s2 + $0x18] sm:$0xff]  ;;  %s364_s21 = sshll.u32 %s205_s19, 4  ;;  %s861_s9 = scalar_lea.hbm %s915_s3, %s473_s18  ;;  %s863_s21 = int_to_ptr.vmem [resolvable:$true] %s364_s21 }
  0x3d   : > { %481 = vmatpush3.bf16.msra.mxu0 %v561_v1  ;;  %235 = vperm.xlu1 %560, %v213_v5   ;;  %v212_v9 = vld [vmem:[%s914_s2 + $0x8] sm:$0xff]  ;;  %s350_s10 = scalar_lea.sflag [#allocation4], %s828_s11  ;;  %s605_s24 = scalar_lea.vmem %s863_s21, 256 }
  0x3e   : > { %482 = vmatprep.subr.bf16.mxu0 %v562_v2  ;;  %225 = vperm.xlu0 %559, %v211_v6   ;;  %v566_v10 = vld [vmem:[%s913_s1 + $0x8] sm:$0xff]   ;;  %p606_p8 = scmp.ne.s32.totalorder %s863_s21, %s605_s24  ;;  %p923_p9 = scmp.ne.s32.totalorder %s919_s25, 0 }
  0x3f   : > { %s693_s15 = smov [#allocation5]  }
  0x40   : > { %p607_p11 = pnand %p606_p8, %p923_p9  ;;  %s609_s22 = sshll.u32 %s693_s15, 4  ;;  %s610_s22 = int_to_ptr.vmem [resolvable:$false] %s609_s22 }
  0x41   : > { %483 = vmatpush3.bf16.msra.mxu0 %v562_v2  ;;  %240 = vperm.xlu1 %560, %v214_v8   ;;  %s611_s23 = scalar_lea.vmem %s610_s22, 512  ;;  %p612_p6 = scmp.lt.s32.totalorder %s863_s21, %s610_s22 }
  0x42   : > { %484 = vmatprep.subr.bf16.mxu0 %v563_v3  ;;  %230 = vperm.xlu0 %559, %v212_v9   ;;  %p608_p0 = pneg %p607_p11  ;;  %p613_p13 = scmp.lt.s32.totalorder %s611_s23, %s605_s24 }
  0x44   : > { %p614_p2 = por %p613_p13, %p612_p6 }
  0x45   : > { %485 = vmatpush3.bf16.msra.mxu0 %v563_v3 }
  0x46   : > { %486 = vmatprep.subr.bf16.mxu0 %v564_v7  ;;  %p615_p5 = pnand %p614_p2, %p608_p0 }
  0x49   : > { %487 = vmatpush3.bf16.msra.mxu0 %v564_v7 }
  0x4c   : > { %489 = vmatmul.mubr.msk.bf16.vlgmr.msra.gmra.mrb[0].mxu0 %vm277_vm0, %v566_v10 }
  0xbc   : > { %v236_v11 = vpop.permute.xlu1 %235 }
  0xbd   : > { %v226_v12 = vpop.permute.xlu0 %225 }
  0xc0   : > { %v241_v16 = vpop.permute.xlu1 %240 }
  0xc1   : > { %v231_v19 = vpop.permute.xlu0 %230 }
 0x11f   : > { %v490_v13 = vpop.f32.mrb[0].mxu0 }
 0x120   : > { %v327_v14 = vadd.f32 %v490_v13, %v236_v11  ;;  %v318_v15 = vpop.f32.mrb[1].mxu0 }
 0x121   : > { %v319_v17 = vadd.f32 %v318_v15, %v226_v12  ;;  %v491_v18 = vpop.f32.mrb[2].mxu0 }
 0x122   : > { %v330_v20 = vadd.f32 %v491_v18, %v241_v16  ;;  %v321_v21 = vpop.f32.mrb[3].mxu0 }
 0x123   : > { %v333_v22 = vmul.f32 %v327_v14, %v319_v17  ;;  %v322_v23 = vadd.f32 %v321_v21, %v231_v19 }
 0x125   : > { %v335_v24 = vsub.f32 0.0, %v333_v22  ;;  %v334_v25 = vmul.f32 %v330_v20, %v322_v23 }
 0x127   : > { %v337_v26 = vmul.f32 1.442695, %v335_v24  ;;  %v336_v27 = vsub.f32 0.0, %v334_v25 }
 0x129   : > { %567 = vpow2.f32 %v337_v26  ;;  %v339_v28 = vmul.f32 1.442695, %v336_v27 }
 0x12b   : > { %569 = vpow2.f32 %v339_v28 }
 0x133   : > { %v568_v29 = vpop.eup %567 }
 0x134   : > { %v341_v30 = vadd.f32 1.0, %v568_v29 }
 0x135   : > { %v570_v31 = vpop.eup %569 }
 0x136   : > { %571 = vrcp.f32 %v341_v30  ;;  %v342_v32 = vadd.f32 1.0, %v570_v31 }
 0x138   : > { %573 = vrcp.f32 %v342_v32 }
 0x140   : > { %v572_v33 = vpop.eup %571 }
 0x141   : > { %347 = vst [vmem:[%s205_s19] sm:$0xff] %v572_v33 }
 0x142   : > { %v574_v34 = vpop.eup %573 }
 0x143   : > { %348 = vst [vmem:[%s205_s19 + $0x8] sm:$0xff] %v574_v34 }
 0x144   : > { %618 = shalt.err (!%p615_p5)
}
 0x145   : > { %s619_s28 = scalar_lea.hbm %s861_s9, 256  ;;  %s623_s4 = scalar_lea.hbm %s915_s3, 512 }
 0x146   : > { %p620_p4 = scmp.ne.s32.totalorder %s861_s9, %s619_s28  ;;  %p624_p12 = scmp.lt.u32.totalorder %s861_s9, %s915_s3 }
 0x147   : > { %p625_p1 = scmp.lt.u32.totalorder %s623_s4, %s619_s28  ;;  %p627_p8 = scmp.lt.u32.totalorder %s619_s28, %s861_s9 }
 0x148   : > { %p621_p7 = pnand %p620_p4, %p923_p9 }
 0x149   : > { %p626_p3 = por %p625_p1, %p624_p12 }
 0x14a   : > { %p622_p10 = pneg %p621_p7 }
 0x14b   : > { %p628_p11 = por %p627_p8, %p626_p3 }
 0x14d   : > { %p629_p0 = pnand %p628_p11, %p622_p10 }
 0x14f   : > { %632 = shalt.err (!%p629_p0)
}
 0x150   : > { %s694_s18 = smov 128   ;;  %s695_s19 = smov 8  }
 0x151   : > { %494 = dma.vmem_to_hbm [thread:$0]  (%p923_p9), %s863_s21, 256, %s861_s9, %s350_s10, %s694_s18, %s694_s18, %s695_s19  }
 0x152 PF: > { %s379_s6 = sand.u32 1, %s667_s12   ;;  %p924_p6 = scmp.ne.s32.totalorder %s920_s27, 0 }
 0x153   : > { %p925_p13 = scmp.ge.s32.totalorder %s687_s17, 2  ;;  %s380_s8 = scalar_lea.sflag [#allocation4], %s379_s6 }
 0x155   : > { %p501_p2 = pnand %p925_p13, %p924_p6 }
 0x157   : > { %662 = dma.done.wait (!%p501_p2), %s380_s8, 256  }
 0x158   : > { %664 = vsyncadd (!%p501_p2), %s380_s8, 4294967040  ;;  %s19_s17 = sadd.s32 1, %s687_s17   ;;  %s926_s12 = smov %s671_s13 }
 0x159   : > { %p16_p5 = scmp.ge.s32.totalorder %s19_s17, 4   ;;  %s927_s13 = smov %s675_s14 }
 0x15a   : > { %s928_s14 = smov %s772_s26  ;;  %s929_s15 = smov %s683_s16 }
 0x15b   : > { %s930_s16 = smov %s932_s20  ;;  %18 = sbr.rel (!%p16_p5) target bundleno = 6 (0x6), region = 77 }
 0x162   :  { %385 = vsyncpa [#allocation3], 1 }
 0x163   :  { %387 = vsyncpa [#allocation3 + $0x1], 1 }
 0x164   :  { %388 = vsyncpa [#allocation4], 1 }
 0x165   :  { %390 = vsyncpa [#allocation4 + $0x1], 1 }

// kernel: tpu_custom_call.1
= control target key start
LH: loop header
LB: loop body
LE: loop exit
PB: predicated region body
PF: predicated region fallthrough
CT: control target
= control target key end

     0   :  { %8 = vsyncpa [#allocation3], 0  ;;  %s912_s0 = inlined_call_operand.hbm [shape: bf16[2,64,128], index: 0, kind: input, shape index: {}]   ;;  %s913_s1 = inlined_call_operand.vmem [shape: bf16[32,64], index: 1, kind: input, shape index: {}]   ;;  %s914_s2 = inlined_call_operand.vmem [shape: f32[32,1], index: 2, kind: input, shape index: {}]   ;;  %s915_s3 = inlined_call_operand.hbm [shape: f32[2,16,128], index: 3, kind: output, shape index: {}]  }
   0x1   :  { %10 = vsyncpa [#allocation3 + $0x1], 0 }
   0x2   :  { %11 = vsyncpa [#allocation4], 0 }
   0x3   :  { %13 = vsyncpa [#allocation4 + $0x1], 0  ;;  %s716_s12 = smov 0   ;;  %s718_s13 = smov 0  }
   0x4   :  { %s720_s14 = smov 0   ;;  %s722_s15 = smov 0  }
   0x5   :  { %s724_s16 = smov 0   ;;  %s726_s17 = smov 0  }
   0x6 LB: > { %s449_s18 = sadd.s32 4294967295, %s687_s17   ;;  %s450_s19 = sadd.s32 4294967294, %s687_s17   ;;  %s687_s17 = sphi %s726_s17, %s19_s17   ;;  %s683_s16 = sphi %s724_s16, %s930_s16   ;;  %s679_s15 = sphi %s722_s15, %s929_s15   ;;  %s675_s14 = sphi %s720_s14, %s928_s14   ;;  %s671_s13 = sphi %s718_s13, %s927_s13   ;;  %s667_s12 = sphi %s716_s12, %s926_s12  }
   0x7   : > { %s31_s20 = sadd.s32 1, %s683_s16  ;;  %s40_s21 = sadd.s32 1, %s675_s14 }
   0x8   : > { %p33_p0 = scmp.ge.s32.totalorder %s31_s20, 2  ;;  %p47_p1 = scmp.ne.s32.totalorder %s675_s14, %s671_s13 }
   0x9   : > { %p48_p2 = scmp.eq.s32.totalorder %s687_s17, 0  ;;  %p53_p3 = scmp.ne.s32.totalorder %s671_s13, %s667_s12 }
   0xa   : > { %s932_s20 = smov (%p33_p0, %s31_s20), 0  ;;  %p54_p5 = scmp.eq.s32.totalorder %s449_s18, 0 }
   0xb   : > { %p757_p4 = por %p48_p2, %p47_p1  ;;  %s35_s23 = ssub.s32 %s683_s16, %s932_s20 }
   0xc   : > { %p121_p6 = scmp.eq.s32.totalorder %s449_s18, 1  ;;  %p38_p7 = scmp.eq.s32.totalorder %s35_s23, 0 }
   0xd   : > { %p763_p8 = por %p54_p5, %p53_p3  ;;  %p127_p10 = scmp.eq.s32.totalorder %s450_s19, 1 }
   0xe   : > { %p767_p9 = por %p121_p6, %p47_p1  ;;  %p504_p13 = scmp.lt.s32.totalorder %s687_s17, 2 }
   0xf   : > { %s772_s26 = scalar_select %p38_p7, %s675_s14, %s40_s21  }
  0x10   : > { %s919_s25 = scalar_select %p767_p9, 1, 0 }
  0x11   : > { %p774_p11 = por %p127_p10, %p53_p3  ;;  %s153_s28 = sand.u32 1, %s675_s14  }
  0x12   : > { %s453_s29 = sshll.u32 %s153_s28, 5  ;;  %s472_s30 = sshll.u32 %s683_s16, 9 }
  0x13   : > { %s920_s27 = scalar_select %p774_p11, 1, 0 }
  0x14   : > { %s785_s6 = scalar_lea.hbm %s912_s0, %s472_s30  ;;  %s157_s7 = scalar_lea.vmem [#allocation2], %s453_s29 }
  0x15   : > { %s165_s8 = sshll.u32 %s157_s7, 4  ;;  %p791_p0 = pnand %p504_p13, %p757_p4  ;;  %s787_s8 = int_to_ptr.vmem [resolvable:$true] %s165_s8 }
  0x16   : > { %s796_s10 = scalar_lea.sflag [#allocation3], %s153_s28  ;;  %s575_s11 = scalar_lea.hbm %s785_s6, 512 }
  0x17   : > { %p576_p2 = scmp.ne.s32.totalorder %s785_s6, %s575_s11  ;;  %p577_p3 = pneg %p791_p0 }
  0x18   : > { %s580_s21 = scalar_lea.hbm %s912_s0, 1024  ;;  %p581_p4 = scmp.lt.u32.totalorder %s785_s6, %s912_s0 }
  0x19   : > { %p578_p5 = pnand %p577_p3, %p576_p2  ;;  %p582_p7 = scmp.lt.u32.totalorder %s580_s21, %s575_s11 }
  0x1a   : > { %p584_p13 = scmp.lt.u32.totalorder %s575_s11, %s785_s6 }
  0x1b   : > { %p579_p6 = pneg %p578_p5  ;;  %p583_p10 = por %p582_p7, %p581_p4 }
  0x1d   : > { %p585_p12 = por %p584_p13, %p583_p10 }
  0x1f   : > { %p586_p1 = pnand %p585_p12, %p579_p6 }
  0x21   : > { %589 = shalt.err (!%p586_p1)
}
  0x22   : > { %s590_s28 = scalar_lea.vmem %s787_s8, 512  ;;  %s689_s29 = smov [#allocation2]  }
  0x23   : > { %p591_p2 = scmp.ne.s32.totalorder %s787_s8, %s590_s28  ;;  %s595_s30 = sshll.u32 %s689_s29, 4  ;;  %s596_s30 = int_to_ptr.vmem [resolvable:$false] %s595_s30 }
  0x24   : > { %s597_s4 = scalar_lea.vmem %s596_s30, 1024  ;;  %p598_p9 = scmp.lt.s32.totalorder %s787_s8, %s596_s30 }
  0x25   : > { %p593_p5 = pnand %p591_p2, %p577_p3  ;;  %p599_p4 = scmp.lt.s32.totalorder %s597_s4, %s590_s28 }
  0x27   : > { %p594_p11 = pneg %p593_p5  ;;  %p600_p7 = por %p599_p4, %p598_p9 }
  0x29   : > { %p601_p10 = pnand %p600_p7, %p594_p11 }
  0x2b   : > { %604 = shalt.err (!%p601_p10)
}
  0x2c   : > { %s690_s5 = smov 64   ;;  %s691_s7 = smov 4  }
  0x2d   : > { %499 = dma.hbm_to_vmem [thread:$0]  (!%p791_p0), %s785_s6, 512, %s787_s8, %s796_s10, %s690_s5, %s690_s5, %s691_s7  }
  0x2e   : > { %p173_p12 = scmp.lt.s32.totalorder %s687_s17, 3  ;;  %p922_p1 = scmp.ge.s32.totalorder %s687_s17, 1 }
  0x30   : > { %p174_p3 = pnand %p922_p1, %p173_p12 }
  0x31   : > { %s828_s11 = sand.u32 (!%p174_p3), 1, %s671_s13  }
  0x32   : > { %177 = sbr.rel (%p174_p3) target bundleno = 338 (0x152), region = 32  ;;  %s457_s18 = sshll.u32 (!%p174_p3), %s828_s11, 5 }
  0x33   : > { %s180_s19 = scalar_lea.sflag (!%p174_p3), [#allocation3], %s828_s11  ;;  %s183_s21 = scalar_lea.vmem (!%p174_p3), [#allocation2], %s457_s18 }
  0x39   : > { %658 = dma.done.wait (%p763_p8), %s180_s19, 512  }
  0x3a   : > { %660 = vsyncadd (%p763_p8), %s180_s19, 4294966784  ;;  %v692_v0 = vmov 0   ;;  %v561_v1 = vld [vmem:[%s183_s21] sm:$0xff]   ;;  %v562_v2 = vld [vmem:[%s183_s21 + $0x8] sm:$0xff]   ;;  %vm277_vm0 = vcmask 523264   ;;  %s458_s7 = sshll.u32 %s828_s11, 4 }
  0x3b   : > { %560 = vset.pattern.permute.xlu1 %v692_v0  ;;  %559 = vset.pattern.permute.xlu0 %v692_v0  ;;  %v563_v3 = vld [vmem:[%s183_s21 + $0x10] sm:$0xff]   ;;  %v565_v4 = vld [vmem:[%s913_s1] sm:$0xff]   ;;  %v564_v7 = vld [vmem:[%s183_s21 + $0x18] sm:$0xff]   ;;  %s473_s18 = sshll.u32 %s679_s15, 8  ;;  %s205_s19 = scalar_lea.vmem [#allocation5], %s458_s7 }
  0x3c   : > { %480 = vmatprep.subr.bf16.mxu0 %v561_v1  ;;  %488 = vmatprep.mubr.msk.bf16.mxu0 %vm277_vm0, %v565_v4  ;;  %v213_v5 = vld [vmem:[%s914_s2 + $0x10] sm:$0xff]  ;;  %v211_v6 = vld [vmem:[%s914_s2] sm:$0xff]  ;;  %v214_v8 = vld [vmem:[%s914_s2 + $0x18] sm:$0xff]  ;;  %s364_s21 = sshll.u32 %s205_s19, 4  ;;  %s861_s9 = scalar_lea.hbm %s915_s3, %s473_s18  ;;  %s863_s21 = int_to_ptr.vmem [resolvable:$true] %s364_s21 }
  0x3d   : > { %481 = vmatpush3.bf16.msra.mxu0 %v561_v1  ;;  %235 = vperm.xlu1 %560, %v213_v5   ;;  %v212_v9 = vld [vmem:[%s914_s2 + $0x8] sm:$0xff]  ;;  %s350_s10 = scalar_lea.sflag [#allocation4], %s828_s11  ;;  %s605_s24 = scalar_lea.vmem %s863_s21, 256 }
  0x3e   : > { %482 = vmatprep.subr.bf16.mxu0 %v562_v2  ;;  %225 = vperm.xlu0 %559, %v211_v6   ;;  %v566_v10 = vld [vmem:[%s913_s1 + $0x8] sm:$0xff]   ;;  %p606_p8 = scmp.ne.s32.totalorder %s863_s21, %s605_s24  ;;  %p923_p9 = scmp.ne.s32.totalorder %s919_s25, 0 }
  0x3f   : > { %s693_s15 = smov [#allocation5]  }
  0x40   : > { %p607_p11 = pnand %p606_p8, %p923_p9  ;;  %s609_s22 = sshll.u32 %s693_s15, 4  ;;  %s610_s22 = int_to_ptr.vmem [resolvable:$false] %s609_s22 }
  0x41   : > { %483 = vmatpush3.bf16.msra.mxu0 %v562_v2  ;;  %240 = vperm.xlu1 %560, %v214_v8   ;;  %s611_s23 = scalar_lea.vmem %s610_s22, 512  ;;  %p612_p6 = scmp.lt.s32.totalorder %s863_s21, %s610_s22 }
  0x42   : > { %484 = vmatprep.subr.bf16.mxu0 %v563_v3  ;;  %230 = vperm.xlu0 %559, %v212_v9   ;;  %p608_p0 = pneg %p607_p11  ;;  %p613_p13 = scmp.lt.s32.totalorder %s611_s23, %s605_s24 }
  0x44   : > { %p614_p2 = por %p613_p13, %p612_p6 }
  0x45   : > { %485 = vmatpush3.bf16.msra.mxu0 %v563_v3 }
  0x46   : > { %486 = vmatprep.subr.bf16.mxu0 %v564_v7  ;;  %p615_p5 = pnand %p614_p2, %p608_p0 }
  0x49   : > { %487 = vmatpush3.bf16.msra.mxu0 %v564_v7 }
  0x4c   : > { %489 = vmatmul.mubr.msk.bf16.vlgmr.msra.gmra.mrb[0].mxu0 %vm277_vm0, %v566_v10 }
  0xbc   : > { %v236_v11 = vpop.permute.xlu1 %235 }
  0xbd   : > { %v226_v12 = vpop.permute.xlu0 %225 }
  0xc0   : > { %v241_v16 = vpop.permute.xlu1 %240 }
  0xc1   : > { %v231_v19 = vpop.permute.xlu0 %230 }
 0x11f   : > { %v490_v13 = vpop.f32.mrb[0].mxu0 }
 0x120   : > { %v327_v14 = vadd.f32 %v490_v13, %v236_v11  ;;  %v318_v15 = vpop.f32.mrb[1].mxu0 }
 0x121   : > { %v319_v17 = vadd.f32 %v318_v15, %v226_v12  ;;  %v491_v18 = vpop.f32.mrb[2].mxu0 }
 0x122   : > { %v330_v20 = vadd.f32 %v491_v18, %v241_v16  ;;  %v321_v21 = vpop.f32.mrb[3].mxu0 }
 0x123   : > { %v333_v22 = vmul.f32 %v327_v14, %v319_v17  ;;  %v322_v23 = vadd.f32 %v321_v21, %v231_v19 }
 0x125   : > { %v335_v24 = vsub.f32 0.0, %v333_v22  ;;  %v334_v25 = vmul.f32 %v330_v20, %v322_v23 }
 0x127   : > { %v337_v26 = vmul.f32 1.442695, %v335_v24  ;;  %v336_v27 = vsub.f32 0.0, %v334_v25 }
 0x129   : > { %567 = vpow2.f32 %v337_v26  ;;  %v339_v28 = vmul.f32 1.442695, %v336_v27 }
 0x12b   : > { %569 = vpow2.f32 %v339_v28 }
 0x133   : > { %v568_v29 = vpop.eup %567 }
 0x134   : > { %v341_v30 = vadd.f32 1.0, %v568_v29 }
 0x135   : > { %v570_v31 = vpop.eup %569 }
 0x136   : > { %571 = vrcp.f32 %v341_v30  ;;  %v342_v32 = vadd.f32 1.0, %v570_v31 }
 0x138   : > { %573 = vrcp.f32 %v342_v32 }
 0x140   : > { %v572_v33 = vpop.eup %571 }
 0x141   : > { %347 = vst [vmem:[%s205_s19] sm:$0xff] %v572_v33 }
 0x142   : > { %v574_v34 = vpop.eup %573 }
 0x143   : > { %348 = vst [vmem:[%s205_s19 + $0x8] sm:$0xff] %v574_v34 }
 0x144   : > { %618 = shalt.err (!%p615_p5)
}
 0x145   : > { %s619_s28 = scalar_lea.hbm %s861_s9, 256  ;;  %s623_s4 = scalar_lea.hbm %s915_s3, 512 }
 0x146   : > { %p620_p4 = scmp.ne.s32.totalorder %s861_s9, %s619_s28  ;;  %p624_p12 = scmp.lt.u32.totalorder %s861_s9, %s915_s3 }
 0x147   : > { %p625_p1 = scmp.lt.u32.totalorder %s623_s4, %s619_s28  ;;  %p627_p8 = scmp.lt.u32.totalorder %s619_s28, %s861_s9 }
 0x148   : > { %p621_p7 = pnand %p620_p4, %p923_p9 }
 0x149   : > { %p626_p3 = por %p625_p1, %p624_p12 }
 0x14a   : > { %p622_p10 = pneg %p621_p7 }
 0x14b   : > { %p628_p11 = por %p627_p8, %p626_p3 }
 0x14d   : > { %p629_p0 = pnand %p628_p11, %p622_p10 }
 0x14f   : > { %632 = shalt.err (!%p629_p0)
}
 0x150   : > { %s694_s18 = smov 128   ;;  %s695_s19 = smov 8  }
 0x151   : > { %494 = dma.vmem_to_hbm [thread:$0]  (%p923_p9), %s863_s21, 256, %s861_s9, %s350_s10, %s694_s18, %s694_s18, %s695_s19  }
 0x152 PF: > { %s379_s6 = sand.u32 1, %s667_s12   ;;  %p924_p6 = scmp.ne.s32.totalorder %s920_s27, 0 }
 0x153   : > { %p925_p13 = scmp.ge.s32.totalorder %s687_s17, 2  ;;  %s380_s8 = scalar_lea.sflag [#allocation4], %s379_s6 }
 0x155   : > { %p501_p2 = pnand %p925_p13, %p924_p6 }
 0x157   : > { %662 = dma.done.wait (!%p501_p2), %s380_s8, 256  }
 0x158   : > { %664 = vsyncadd (!%p501_p2), %s380_s8, 4294967040  ;;  %s19_s17 = sadd.s32 1, %s687_s17   ;;  %s926_s12 = smov %s671_s13 }
 0x159   : > { %p16_p5 = scmp.ge.s32.totalorder %s19_s17, 4   ;;  %s927_s13 = smov %s675_s14 }
 0x15a   : > { %s928_s14 = smov %s772_s26  ;;  %s929_s15 = smov %s683_s16 }
 0x15b   : > { %s930_s16 = smov %s932_s20  ;;  %18 = sbr.rel (!%p16_p5) target bundleno = 6 (0x6), region = 77 }
 0x162   :  { %385 = vsyncpa [#allocation3], 1 }
 0x163   :  { %387 = vsyncpa [#allocation3 + $0x1], 1 }
 0x164   :  { %388 = vsyncpa [#allocation4], 1 }
 0x165   :  { %390 = vsyncpa [#allocation4 + $0x1], 1 }

</bundles_post_ra>
